<compile_context>
chip_gen: v5e
topology: v5e:2x2
jax: 0.10.0
libtpu: 0.0.40
codegen_flags: <defaults>
</compile_context>

<pallas_src>
import functools

import jax
import jax.numpy as jnp
from jax.experimental import pallas as pl
from jax.experimental.pallas import tpu as pltpu

LEAKY_SLOPE = 0.1
NUM_ANCHORS = 3
NUM_CLASSES = 4  # small synthetic class count (real YOLO uses 80)
# NOTE: anchors here are in grid-cell units (multiplied by stride in decode).
# Real Darknet anchors are usually in pixels — do NOT also multiply by stride.
ANCHORS = ((1.0, 1.5), (2.0, 2.5), (3.5, 1.0))
LANES = 128


def _round_up(x, m):
    return (x + m - 1) // m * m


def _pick_m_tile(m):
    """M tile: big enough to amortize grid-step overhead, small enough to
    give >=2 grid steps so v7x can shard the parallel axis across its 2 TCs."""
    for c in (1024, 512, 256, 128):
        if m % c == 0 and m // c >= 2:
            return c
    if m % 2 == 0 and (m // 2) % 8 == 0 and m // 2 >= 8:
        return m // 2
    return m


# ----------------------------------------------------------------------------
# Pallas GEMM kernel (conv1 / conv2 via im2col)
# ----------------------------------------------------------------------------
def _gemm_bias_act_kernel(x_ref, w_ref, b_ref, o_ref, *, slope, apply_act):
    """One M-tile of: out = leaky_relu(x @ w + b)  (bf16 in, f32 epilogue)."""
    acc = jnp.dot(x_ref[...], w_ref[...], preferred_element_type=jnp.float32)
    acc = acc + b_ref[...]
    if apply_act:
        acc = jnp.maximum(acc, slope * acc)      # leaky ReLU, single VPU max
    o_ref[...] = acc.astype(o_ref.dtype)


def gemm_bias_act(x, w, b, *, slope, apply_act, out_dtype, pad_n):
    """x:[M,K] @ w:[K,N] + b with optional leaky-ReLU.

    K is always zero-padded to a multiple of 128 (lane-dense, aligned MXU
    operand loads; the MXU burns a full 128-deep pass regardless of K).
    N is padded to 128 only when `pad_n` (kept narrow for small conv outputs
    to avoid 4-8x HBM write inflation).
    """
    M, K = x.shape
    N = w.shape[1]
    k_pad = _round_up(K, LANES)
    if k_pad != K:
        x = jnp.pad(x, ((0, 0), (0, k_pad - K)))
        w = jnp.pad(w, ((0, k_pad - K), (0, 0)))
    n_out = _round_up(N, LANES) if pad_n else N
    if n_out != N:
        w = jnp.pad(w, ((0, 0), (0, n_out - N)))
        b = jnp.pad(b, ((0, n_out - N),))

    tm = _pick_m_tile(M)
    m_pad = _round_up(M, tm)
    if m_pad != M:
        x = jnp.pad(x, ((0, m_pad - M), (0, 0)))

    xb = x.astype(jnp.bfloat16)
    wb = w.astype(jnp.bfloat16)
    bf = b.astype(jnp.float32).reshape(1, n_out)

    # TODO(synk): for real Darknet depths (K ~ 9*1024) add a K grid axis with a
    # f32 VMEM accumulator (pl.when init/finalize); size (tm, tk, tn) per
    # generation (half the budget on v7x's 64 MiB VMEM, 256-wide N/K on v6e).
    kernel = functools.partial(_gemm_bias_act_kernel, slope=slope,
                               apply_act=apply_act)
    out = pl.pallas_call(
        kernel,
        out_shape=jax.ShapeDtypeStruct((m_pad, n_out), out_dtype),
        grid_spec=pltpu.PrefetchScalarGridSpec(
            num_scalar_prefetch=0,
            grid=(m_pad // tm,),
            in_specs=[
                pl.BlockSpec((tm, k_pad), lambda i: (i, 0)),
                pl.BlockSpec((k_pad, n_out), lambda i: (0, 0)),
                pl.BlockSpec((1, n_out), lambda i: (0, 0)),
            ],
            out_specs=pl.BlockSpec((tm, n_out), lambda i: (i, 0)),
        ),
        compiler_params=pltpu.CompilerParams(
            dimension_semantics=("parallel",)),
    )(xb, wb, bf)
    return out[:M] if m_pad != M else out


# ----------------------------------------------------------------------------
# Glue: channels-last im2col (the GEMM itself runs inside the Pallas kernel)
# ----------------------------------------------------------------------------
def _im2col_nhwc(x, cin, k, stride, pad):
    """x:[N,H,W,>=cin] channels-last -> ([N*Ho*Wo, k*k*cin], Ho, Wo)."""
    nf, h, w_, _ = x.shape
    x = x[..., :cin]
    if pad:
        x = jnp.pad(x, ((0, 0), (pad, pad), (pad, pad), (0, 0)))
    ho = (h + 2 * pad - k) // stride + 1
    wo = (w_ + 2 * pad - k) // stride + 1
    if k == 1 and stride == 1:
        return x.reshape(nf * ho * wo, cin), ho, wo
    patches = []
    for di in range(k):
        for dj in range(k):
            patches.append(x[:, di:di + stride * ho:stride,
                             dj:dj + stride * wo:stride, :])
    cols = jnp.stack(patches, axis=3)            # [N, Ho, Wo, k*k, cin]
    return cols.reshape(nf * ho * wo, k * k * cin), ho, wo


def conv2d_act(x_nhwc, cin, w, b, *, stride, pad, slope, apply_act,
               out_dtype, pad_n):
    """x NHWC; w PyTorch [Cout,Cin,k,k]. Returns NHWC (Cout padded iff pad_n)."""
    cout, _, k, _ = w.shape
    cols, ho, wo = _im2col_nhwc(x_nhwc, cin, k, stride, pad)
    wmat = w.transpose(2, 3, 1, 0).reshape(k * k * cin, cout)   # (di,dj,c) rows
    out = gemm_bias_act(cols, wmat, b, slope=slope, apply_act=apply_act,
                        out_dtype=out_dtype, pad_n=pad_n)
    nf = x_nhwc.shape[0]
    return out.reshape(nf, ho, wo, out.shape[1])


# ----------------------------------------------------------------------------
# Fused YOLO head (1x1 conv) + decode + select_iou_GT kernel
# ----------------------------------------------------------------------------
def _head_decode_iou_kernel(gt_ref, x_ref, wt_ref, b_ref, gxy_ref,
                            dec_ref, iou_ref, *, a, d, stride):
    """One (frame, row-tile) block.

    raw head output is produced feature-major [NPAD, tr] straight off the MXU
    (contract both operands on their last dim == w @ x^T), so the decode and
    IoU math run on fully lane-dense [*, tr] rows.
    """
    f = pl.program_id(0)

    raw = jax.lax.dot_general(
        wt_ref[...], x_ref[0],
        dimension_numbers=(((1,), (1,)), ((), ())),
        preferred_element_type=jnp.float32)          # [NPAD, tr]
    raw = raw + b_ref[...]                           # per-feature-row bias

    gx = gxy_ref[0:1, :]                             # [1, tr] grid x offsets
    gy = gxy_ref[1:2, :]                             # [1, tr] grid y offsets

    # Frame's GT box corners + area: O(1) SMEM scalar loads (no select chain).
    qx1 = gt_ref[5 * f + 0]
    qy1 = gt_ref[5 * f + 1]
    qx2 = gt_ref[5 * f + 2]
    qy2 = gt_ref[5 * f + 3]
    g_area = gt_ref[5 * f + 4]

    tr = dec_ref.shape[2]
    dec_rows = []
    iou_rows = []
    for ai in range(a):                              # static loop over anchors
        base = ai * d
        aw = ANCHORS[ai][0] * stride                 # compile-time constants
        ah = ANCHORS[ai][1] * stride
        bx = (jax.nn.sigmoid(raw[base + 0:base + 1, :]) + gx) * stride
        by = (jax.nn.sigmoid(raw[base + 1:base + 2, :]) + gy) * stride
        bw = jnp.exp(raw[base + 2:base + 3, :]) * aw
        bh = jnp.exp(raw[base + 3:base + 4, :]) * ah
        conf = jax.nn.sigmoid(raw[base + 4:base + d, :])   # obj + classes
        dec_rows.append(jnp.concatenate([bx, by, bw, bh, conf], axis=0))

        # IoU vs the frame GT box — all operands are lane-dense [1, tr].
        px1 = bx - 0.5 * bw
        px2 = bx + 0.5 * bw
        py1 = by - 0.5 * bh
        py2 = by + 0.5 * bh
        iw = jnp.maximum(jnp.minimum(px2, qx2) - jnp.maximum(px1, qx1), 0.0)
        ih = jnp.maximum(jnp.minimum(py2, qy2) - jnp.maximum(py1, qy1), 0.0)
        inter = iw * ih
        union = bw * bh + g_area - inter + 1e-16
        iou = inter * pl.reciprocal(union, approx=True)    # EUP, not VALU
        iou_rows.append(jnp.minimum(iou, 1.0))

    dec_pad = dec_ref.shape[1] - a * d
    if dec_pad:
        dec_rows.append(jnp.zeros((dec_pad, tr), jnp.float32))
    iou_pad = iou_ref.shape[1] - a
    if iou_pad:
        iou_rows.append(jnp.zeros((iou_pad, tr), jnp.float32))
    dec_ref[...] = jnp.concatenate(dec_rows, axis=0)[None]
    iou_ref[...] = jnp.concatenate(iou_rows, axis=0)[None]


def head_decode_iou(x_head, wt, b_fm, gxy, gt_flat, *, num_anchors, d,
                    stride, tr):
    nf, gg_pad, kpad = x_head.shape
    npad = wt.shape[0]
    apad = _round_up(num_anchors, 8)
    kernel = functools.partial(_head_decode_iou_kernel, a=num_anchors, d=d,
                               stride=float(stride))
    return pl.pallas_call(
        kernel,
        out_shape=(jax.ShapeDtypeStruct((nf, npad, gg_pad), jnp.float32),
                   jax.ShapeDtypeStruct((nf, apad, gg_pad), jnp.float32)),
        grid_spec=pltpu.PrefetchScalarGridSpec(
            num_scalar_prefetch=0,
            grid=(nf, gg_pad // tr),
            in_specs=[
                pl.BlockSpec(memory_space=pltpu.MemorySpace.SMEM),     # gt
                pl.BlockSpec((1, tr, kpad), lambda f, r: (f, r, 0)),   # x
                pl.BlockSpec((npad, kpad), lambda f, r: (0, 0)),       # head w^T
                pl.BlockSpec((npad, 1), lambda f, r: (0, 0)),          # head b
                pl.BlockSpec((2, tr), lambda f, r: (0, r)),            # grid x/y
            ],
            out_specs=[
                pl.BlockSpec((1, npad, tr), lambda f, r: (f, 0, r)),   # decoded
                pl.BlockSpec((1, apad, tr), lambda f, r: (f, 0, r)),   # iou
            ],
        ),
        compiler_params=pltpu.CompilerParams(
            dimension_semantics=("parallel", "parallel")),
    )(gt_flat, x_head, wt, b_fm, gxy)


# ----------------------------------------------------------------------------
# Det_VIBE forward (gt_bbox branch)
# ----------------------------------------------------------------------------
def init_params(key):
    ks = jax.random.split(key, 3)
    # mimics weights_init_normal: N(0, 0.02)
    nrm = lambda k, s: 0.02 * jax.random.normal(k, s, jnp.float32)
    ch_head = NUM_ANCHORS * (5 + NUM_CLASSES)
    return dict(
        w1=nrm(ks[0], (16, 3, 3, 3)), b1=jnp.zeros((16,), jnp.float32),
        w2=nrm(ks[1], (32, 16, 3, 3)), b2=jnp.zeros((32,), jnp.float32),
        wh=nrm(ks[2], (ch_head, 32, 1, 1)),
        bh=jnp.zeros((ch_head,), jnp.float32),
    )


def det_vibe_forward(params, img_batch, gt_bbox_batch):
    B, T, C, H, W = img_batch.shape
    nf = B * T
    # img_batch.view([-1, C, H, W]); gt_bbox_batch.view([-1, D])
    img_yolo = img_batch.reshape(nf, C, H, W)
    gt_yolo = gt_bbox_batch.reshape(nf, gt_bbox_batch.shape[2])

    # Single NCHW -> NHWC conversion; everything downstream is channels-last.
    x = img_yolo.transpose(0, 2, 3, 1)

    # -- Darknet-style detector (synthetic small backbone + YOLO head) --------
    # conv1: 3->16, stride 1.  Real Cout kept (no 8x lane-pad HBM inflation).
    x = conv2d_act(x, C, params["w1"], params["b1"], stride=1, pad=1,
                   slope=LEAKY_SLOPE, apply_act=True, out_dtype=jnp.bfloat16,
                   pad_n=False)
    # conv2: 16->32, stride 2.  Cout padded to 128 deliberately: its output is
    # exactly the fused head GEMM's contracting dim, so the pad doubles as the
    # head K-pad (padded channels are exact zeros) with no extra XLA pad op.
    x = conv2d_act(x, 16, params["w2"], params["b2"], stride=2, pad=1,
                   slope=LEAKY_SLOPE, apply_act=True, out_dtype=jnp.bfloat16,
                   pad_n=True)

    A, NC = NUM_ANCHORS, NUM_CLASSES
    D = 5 + NC
    G = x.shape[1]
    GG = G * G
    stride = H // G

    kpad = x.shape[-1]                       # conv2 lane pad == head K pad
    tr = min(512, _round_up(GG, 8))          # decode row tile (lanes)
    gg_pad = _round_up(GG, tr)
    x_head = x.reshape(nf, GG, kpad)         # 1x1 conv: im2col is a reshape
    if gg_pad != GG:
        x_head = jnp.pad(x_head, ((0, 0), (0, gg_pad - GG), (0, 0)))

    # Head weights already laid out [N=A*D, K=32]; pad to [32, kpad].
    npad = _round_up(A * D, 8)
    wt = params["wh"][:, :, 0, 0]
    wt = jnp.pad(wt, ((0, npad - A * D), (0, kpad - wt.shape[1])))
    wt = wt.astype(jnp.bfloat16)
    b_fm = jnp.pad(params["bh"], ((0, npad - A * D),))
    b_fm = b_fm.astype(jnp.float32).reshape(npad, 1)

    # Host-precomputed per-cell grid offsets (no power-of-two assumption).
    cells = jnp.arange(GG, dtype=jnp.int32)
    gxy = jnp.stack([(cells % G).astype(jnp.float32),
                     (cells // G).astype(jnp.float32)], axis=0)       # [2, GG]
    if gg_pad != GG:
        gxy = jnp.pad(gxy, ((0, 0), (0, gg_pad - GG)))

    # GT (cls, cx, cy, w, h) normalized -> pixel corners + area, flat for SMEM.
    gcx = gt_yolo[:, 1] * W
    gcy = gt_yolo[:, 2] * H
    gtw = gt_yolo[:, 3] * W
    gth = gt_yolo[:, 4] * H
    gt_flat = jnp.stack([gcx - 0.5 * gtw, gcy - 0.5 * gth,
                         gcx + 0.5 * gtw, gcy + 0.5 * gth,
                         gtw * gth], axis=-1).reshape(-1).astype(jnp.float32)

    dec_out, iou_out = head_decode_iou(x_head, wt, b_fm, gxy, gt_flat,
                                       num_anchors=A, d=D, stride=stride,
                                       tr=tr)

    # Back to the reference layouts (tiny output-only reshapes/transposes).
    dec_sl = dec_out[:, :A * D, :GG]                       # [nf, A*D, GG]
    yolo_output = dec_sl.reshape(nf, A, D, GG).transpose(0, 1, 3, 2)
    yolo_output = yolo_output.reshape(nf, A * GG, D)
    iou = iou_out[:, :A, :GG].reshape(nf, A * GG)
    # TODO(synk): confirm whether reference select_iou_GT uses '>' or '>=' at
    # the 0.5 threshold.
    selected = iou >= 0.5
    return yolo_output, iou, selected


# ----------------------------------------------------------------------------
if __name__ == "__main__":
    key = jax.random.PRNGKey(0)
    k_img, k_gt, k_p = jax.random.split(key, 3)

    B, T, C, H, W = 2, 2, 3, 16, 16
    img_batch = jax.random.normal(k_img, (B, T, C, H, W), jnp.float32)
    gt_cls = jnp.zeros((B, T, 1), jnp.float32)
    gt_xy = jax.random.uniform(k_gt, (B, T, 2), jnp.float32, 0.3, 0.7)
    gt_wh = jax.random.uniform(jax.random.fold_in(k_gt, 1), (B, T, 2),
                               jnp.float32, 0.1, 0.4)
    gt_bbox_batch = jnp.concatenate([gt_cls, gt_xy, gt_wh], axis=-1)

    params = init_params(k_p)
    yolo_output, iou, selected = det_vibe_forward(params, img_batch,
                                                  gt_bbox_batch)
    jax.block_until_ready((yolo_output, iou, selected))

    assert yolo_output.shape == (B * T, NUM_ANCHORS * 8 * 8, 5 + NUM_CLASSES)
    assert iou.shape == (B * T, NUM_ANCHORS * 8 * 8)
    assert selected.shape == iou.shape
    assert bool(jnp.all(jnp.isfinite(yolo_output)))
    assert bool(jnp.all((iou >= 0.0) & (iou <= 1.0)))
    print("KERNEL_OK")
</pallas_src>

<mosaic_0001>
module attributes {stable_mosaic.version = 11 : i64} {
  func.func @_gemm_bias_act_kernel(%arg0: i32, %arg1: memref<512x128xbf16, #tpu.memory_space<vmem>>, %arg2: memref<128x16xbf16, #tpu.memory_space<vmem>>, %arg3: memref<1x16xf32, #tpu.memory_space<vmem>>, %arg4: memref<512x16xbf16, #tpu.memory_space<vmem>>) attributes {dimension_semantics = [#tpu.dimension_semantics<parallel>], iteration_bounds = array<i64: 2>, scalar_prefetch = 0 : i64, scratch_operands = 0 : i64, tpu.core_type = #tpu.core_type<tc>, window_params = [{transform_indices = @transform_0, window_bounds = array<i64: 512, 128>}, {pipeline_mode = #tpu.pipeline_mode<synchronous>, transform_indices = @transform_1, window_bounds = array<i64: 128, 16>}, {pipeline_mode = #tpu.pipeline_mode<synchronous>, transform_indices = @transform_2, window_bounds = array<i64: 1, 16>}, {transform_indices = @transform_3, window_bounds = array<i64: 512, 16>}]} {
    %c0 = arith.constant 0 : index
    %c0_0 = arith.constant 0 : index
    %0 = vector.load %arg1[%c0, %c0_0] : memref<512x128xbf16, #tpu.memory_space<vmem>>, vector<512x128xbf16>
    %c0_1 = arith.constant 0 : index
    %c0_2 = arith.constant 0 : index
    %1 = vector.load %arg2[%c0_1, %c0_2] : memref<128x16xbf16, #tpu.memory_space<vmem>>, vector<128x16xbf16>
    %cst = arith.constant dense<0.000000e+00> : vector<512x16xf32>
    %2 = tpu.matmul %0, %1, %cst {dimension_numbers = #tpu.dot_dimension_numbers<[1], [0], [0], [1], [0, 0, 1, 1], [], []>} : vector<512x128xbf16>, vector<128x16xbf16>, vector<512x16xf32> -> vector<512x16xf32>
    %c0_3 = arith.constant 0 : index
    %c0_4 = arith.constant 0 : index
    %3 = vector.load %arg3[%c0_3, %c0_4] : memref<1x16xf32, #tpu.memory_space<vmem>>, vector<1x16xf32>
    %4 = vector.broadcast %3 : vector<1x16xf32> to vector<512x16xf32>
    %5 = arith.addf %2, %4 : vector<512x16xf32>
    %cst_5 = arith.constant 1.000000e-01 : f32
    %6 = vector.broadcast %cst_5 : f32 to vector<512x16xf32>
    %7 = arith.mulf %6, %5 : vector<512x16xf32>
    %8 = arith.maximumf %5, %7 : vector<512x16xf32>
    %9 = arith.truncf %8 : vector<512x16xf32> to vector<512x16xbf16>
    %c0_6 = arith.constant 0 : index
    %c0_7 = arith.constant 0 : index
    %10 = vector.load %arg4[%c0_6, %c0_7] : memref<512x16xbf16, #tpu.memory_space<vmem>>, vector<512x16xbf16>
    tpu.vector_store %arg4[%c0_6, %c0_7], %9 {strides = array<i32>} : memref<512x16xbf16, #tpu.memory_space<vmem>>, vector<512x16xbf16>,
    return
  }
  func.func @transform_0(%arg0: i32) -> (i32, i32) {
    %c0_i32 = arith.constant 0 : i32
    %c0_i32_0 = arith.constant 0 : i32
    return %arg0, %c0_i32 : i32, i32
  }
  func.func @transform_1(%arg0: i32) -> (i32, i32) {
    %c0_i32 = arith.constant 0 : i32
    %c0_i32_0 = arith.constant 0 : i32
    %c0_i32_1 = arith.constant 0 : i32
    return %c0_i32, %c0_i32_0 : i32, i32
  }
  func.func @transform_2(%arg0: i32) -> (i32, i32) {
    %c0_i32 = arith.constant 0 : i32
    %c0_i32_0 = arith.constant 0 : i32
    %c0_i32_1 = arith.constant 0 : i32
    return %c0_i32, %c0_i32_0 : i32, i32
  }
  func.func @transform_3(%arg0: i32) -> (i32, i32) {
    %c0_i32 = arith.constant 0 : i32
    %c0_i32_0 = arith.constant 0 : i32
    return %arg0, %c0_i32 : i32, i32
  }
}

</mosaic_0001>

<bundles_post_ra>
// kernel: tpu_custom_call.1
= control target key start
LH: loop header
LB: loop body
LE: loop exit
PB: predicated region body
PF: predicated region fallthrough
CT: control target
= control target key end

     0   :  { %8 = vsyncpa [#allocation3], 0  ;;  %s1728_s0 = inlined_call_operand.hbm [shape: bf16[1024,128], index: 0, kind: input, shape index: {}]   ;;  %s1729_s1 = inlined_call_operand.vmem [shape: bf16[128,16], index: 1, kind: input, shape index: {}]   ;;  %s1730_s2 = inlined_call_operand.vmem [shape: f32[1,16], index: 2, kind: input, shape index: {}]   ;;  %s1731_s3 = inlined_call_operand.vmem [shape: bf16[1024,16], index: 3, kind: output, shape index: {}]  }
   0x1   :  { %10 = vsyncpa [#allocation3 + $0x1], 0  ;;  %s1380_s12 = smov 0   ;;  %s1382_s13 = smov 0  }
   0x2   :  { %s1384_s14 = smov 0   ;;  %s1386_s15 = smov 0  }
   0x3 LB: > { %s1012_s16 = sadd.s32 4294967295, %s1356_s15   ;;  %s1400_s17 = sadd.s32 1, %s1356_s15   ;;  %s1356_s15 = sphi %s1386_s15, %s1738_s15   ;;  %s1352_s14 = sphi %s1384_s14, %s1737_s14   ;;  %s1348_s13 = sphi %s1382_s13, %s1736_s13   ;;  %s1344_s12 = sphi %s1380_s12, %s1735_s12  }
   0x4   : > { %s20_s18 = ssub.s32 %s1356_s15, %s1400_s17  ;;  %s23_s19 = sadd.s32 1, %s1352_s14 }
   0x5   : > { %p21_p0 = scmp.eq.s32.totalorder %s20_s18, 0  ;;  %p30_p1 = scmp.ne.s32.totalorder %s1352_s14, %s1348_s13 }
   0x6   : > { %p31_p2 = scmp.eq.s32.totalorder %s1356_s15, 0  ;;  %p36_p3 = scmp.ne.s32.totalorder %s1348_s13, %s1344_s12 }
   0x7   : > { %s1410_s20 = scalar_select %p21_p0, %s1352_s14, %s23_s19  }
   0x8   : > { %p1412_p4 = por %p31_p2, %p30_p1  ;;  %p37_p5 = scmp.eq.s32.totalorder %s1012_s16, 0 }
   0x9   : > { %p1256_p6 = scmp.lt.s32.totalorder %s1356_s15, 2  ;;  %s134_s23 = sand.u32 1, %s1352_s14  }
   0xa   : > { %p1419_p7 = por %p37_p5, %p36_p3  ;;  %s1016_s24 = sshll.u32 %s134_s23, 8 }
   0xb   : > { %s1185_s25 = sshll.u32 %s1356_s15, 8  ;;  %s138_s29 = scalar_lea.vmem [#allocation2], %s1016_s24 }
   0xc   : > { %s143_s28 = scalar_lea.hbm %s1728_s0, %s1185_s25  ;;  %s146_s30 = sshll.u32 %s138_s29, 4  ;;  %s147_s30 = int_to_ptr.vmem [resolvable:$true] %s146_s30 }
   0xd   : > { %s144_s4 = sshll.u32 %s143_s28, 4  ;;  %p1430_p8 = pnand %p1256_p6, %p1412_p4  ;;  %s145_s4 = int_to_ptr.hbm [resolvable:$true] %s144_s4 }
   0xe   : > { %p1019_p9 = scmp.ge.s32.totalorder %s1356_s15, 1  ;;  %s135_s6 = scalar_lea.sflag [#allocation3], %s134_s23 }
   0xf   : > { %s1292_s7 = sshra.s32 %s145_s4, 4  ;;  %p1296_p11 = pneg %p1430_p8  ;;  %s1293_s7 = int_to_ptr.hbm [resolvable:$true] %s1292_s7 }
  0x10   : > { %s1294_s8 = scalar_lea.hbm %s1293_s7, 256  ;;  %s1299_s11 = scalar_lea.hbm %s1728_s0, 512 }
  0x11   : > { %p1295_p10 = scmp.ne.s32.totalorder %s1293_s7, %s1294_s8  ;;  %p1300_p0 = scmp.lt.s32.totalorder %s1293_s7, %s1728_s0 }
  0x12   : > { %p1301_p1 = scmp.lt.s32.totalorder %s1299_s11, %s1294_s8 }
  0x13   : > { %p1297_p12 = pnand %p1296_p11, %p1295_p10 }
  0x14   : > { %p1302_p2 = por %p1301_p1, %p1300_p0 }
  0x15   : > { %p1298_p13 = pneg %p1297_p12 }
  0x17   : > { %p1303_p3 = pnand %p1302_p2, %p1298_p13 }
  0x19   : > { %1306 = shalt.err (!%p1303_p3)
}
  0x1a   : > { %s1358_s19 = smov 64   ;;  %s1359_s21 = smov 4  }
  0x1b   : > { %1255 = dma.hbm_to_vmem [thread:$0]  (!%p1430_p8), %s145_s4, 4096, %s147_s30, %s135_s6, %s1358_s19, %s1358_s19, %s1359_s21  }
  0x1c   : > { %p154_p4 = scmp.lt.s32.totalorder %s1356_s15, 3 }
  0x1e   : > { %p155_p5 = pnand %p1019_p9, %p154_p4 }
  0x1f   : > { %s160_s23 = sand.u32 (!%p155_p5), 1, %s1348_s13  }
  0x20   : > { %158 = sbr.rel (%p155_p5) target bundleno = 333 (0x14d), region = 32  ;;  %s1020_s24 = sshll.u32 (!%p155_p5), %s160_s23, 8 }
  0x21   : > { %s161_s25 = scalar_lea.sflag (!%p155_p5), [#allocation3], %s160_s23  ;;  %s1449_s26 = scalar_lea.vmem (!%p155_p5), [#allocation2], %s1020_s24 }
  0x25   : > { %1339 = dma.done.wait (%p1419_p7), %s161_s25, 4096  }
  0x26   : > { %1341 = vsyncadd (%p1419_p7), %s161_s25, 4294963200  ;;  %v1225_v0 = vld [vmem:[%s1729_s1 + $0x38] sm:$0xff]  ;;  %v1224_v1 = vld [vmem:[%s1729_s1 + $0x30] sm:$0xff]  ;;  %s1021_s21 = sshll.u32 %s1012_s16, 6  ;;  %vm880_vm0 = vcmask 125952  }
  0x27   : > { %519 = vmatpush.bf16.msra.mxu0 %v1225_v0  ;;  %1226 = vmatpush.bf16.msra.mxu1 %v1225_v0  ;;  %v1223_v2 = vld [vmem:[%s1729_s1 + $0x28] sm:$0xff]  ;;  %v1222_v3 = vld [vmem:[%s1729_s1 + $0x20] sm:$0xff]  ;;  %v1221_v4 = vld [vmem:[%s1729_s1 + $0x18] sm:$0xff]  ;;  %p190_p6 = scmp.lt.s32.totalorder %s1021_s21, 127 }
  0x28   : > { %1227 = vmatpush.bf16.msra.mxu2 %v1225_v0  ;;  %1228 = vmatpush.bf16.msra.mxu3 %v1225_v0  ;;  %v1220_v5 = vld [vmem:[%s1729_s1 + $0x10] sm:$0xff]  ;;  %v1219_v6 = vld [vmem:[%s1729_s1 + $0x8] sm:$0xff]  ;;  %v1218_v7 = vld [vmem:[%s1729_s1] sm:$0xff] }
  0x29   : > { %v1186_v8 = vld [vmem:[%s1449_s26] sm:$0xff]  ;;  %v1187_v12 = vld [vmem:[%s1449_s26 + $0x8] sm:$0xff]  ;;  %v1188_v16 = vld [vmem:[%s1449_s26 + $0x10] sm:$0xff]  ;;  %s1740_s21 = smov (!%p190_p6, %s1021_s21), 127 }
  0x2a   : > { %v1194_v9 = vld [vmem:[%s1449_s26 + $0x40] sm:$0xff]  ;;  %v1195_v13 = vld [vmem:[%s1449_s26 + $0x48] sm:$0xff]  ;;  %v1196_v17 = vld [vmem:[%s1449_s26 + $0x50] sm:$0xff]  ;;  %s1022_s25 = sshll.u32 %s1740_s21, 2 }
  0x2b   : > { %520 = vmatpush.bf16.msra.mxu0 %v1224_v1  ;;  %1229 = vmatpush.bf16.msra.mxu1 %v1224_v1  ;;  %v1202_v10 = vld [vmem:[%s1449_s26 + $0x80] sm:$0xff]  ;;  %v1203_v14 = vld [vmem:[%s1449_s26 + $0x88] sm:$0xff]  ;;  %v1204_v18 = vld [vmem:[%s1449_s26 + $0x90] sm:$0xff] }
  0x2c   : > { %1230 = vmatpush.bf16.msra.mxu2 %v1224_v1  ;;  %1231 = vmatpush.bf16.msra.mxu3 %v1224_v1  ;;  %v1210_v11 = vld [vmem:[%s1449_s26 + $0xc0] sm:$0xff]  ;;  %v1211_v15 = vld [vmem:[%s1449_s26 + $0xc8] sm:$0xff]  ;;  %v1212_v19 = vld [vmem:[%s1449_s26 + $0xd0] sm:$0xff] }
  0x2d   : > { %v1189_v20 = vld [vmem:[%s1449_s26 + $0x18] sm:$0xff]  ;;  %v1190_v24 = vld [vmem:[%s1449_s26 + $0x20] sm:$0xff]  ;;  %v1191_v28 = vld [vmem:[%s1449_s26 + $0x28] sm:$0xff] }
  0x2e   : > { %v1197_v21 = vld [vmem:[%s1449_s26 + $0x58] sm:$0xff]  ;;  %v1198_v25 = vld [vmem:[%s1449_s26 + $0x60] sm:$0xff]  ;;  %v1199_v29 = vld [vmem:[%s1449_s26 + $0x68] sm:$0xff] }
  0x2f   : > { %521 = vmatpush.bf16.msra.mxu0 %v1223_v2  ;;  %1232 = vmatpush.bf16.msra.mxu1 %v1223_v2  ;;  %v1205_v22 = vld [vmem:[%s1449_s26 + $0x98] sm:$0xff]  ;;  %v1206_v26 = vld [vmem:[%s1449_s26 + $0xa0] sm:$0xff]  ;;  %v1207_v30 = vld [vmem:[%s1449_s26 + $0xa8] sm:$0xff] }
  0x30   : > { %1233 = vmatpush.bf16.msra.mxu2 %v1223_v2  ;;  %1234 = vmatpush.bf16.msra.mxu3 %v1223_v2  ;;  %v1213_v23 = vld [vmem:[%s1449_s26 + $0xd8] sm:$0xff]  ;;  %v1214_v27 = vld [vmem:[%s1449_s26 + $0xe0] sm:$0xff]  ;;  %v1215_v31 = vld [vmem:[%s1449_s26 + $0xe8] sm:$0xff] }
  0x31   : > { %v1192_v32 = vld [vmem:[%s1449_s26 + $0x30] sm:$0xff]  ;;  %v1193_v36 = vld [vmem:[%s1449_s26 + $0x38] sm:$0xff]  ;;  %v1516_v40 = vld [vmem:[%s1730_s2] ss:$0 sm:$0xff] }
  0x32   : > { %v1200_v33 = vld [vmem:[%s1449_s26 + $0x70] sm:$0xff]  ;;  %v1201_v37 = vld [vmem:[%s1449_s26 + $0x78] sm:$0xff] }
  0x33   : > { %522 = vmatpush.bf16.msra.mxu0 %v1222_v3  ;;  %1235 = vmatpush.bf16.msra.mxu1 %v1222_v3  ;;  %v1208_v34 = vld [vmem:[%s1449_s26 + $0xb0] sm:$0xff]  ;;  %v1209_v38 = vld [vmem:[%s1449_s26 + $0xb8] sm:$0xff] }
  0x34   : > { %1236 = vmatpush.bf16.msra.mxu2 %v1222_v3  ;;  %1237 = vmatpush.bf16.msra.mxu3 %v1222_v3  ;;  %v1216_v35 = vld [vmem:[%s1449_s26 + $0xf0] sm:$0xff]  ;;  %v1217_v39 = vld [vmem:[%s1449_s26 + $0xf8] sm:$0xff]  ;;  %s1523_s26 = scalar_lea.vmem %s1731_s3, %s1022_s25 }
  0x37   : > { %523 = vmatpush.bf16.msra.mxu0 %v1221_v4  ;;  %1238 = vmatpush.bf16.msra.mxu1 %v1221_v4 }
  0x38   : > { %1239 = vmatpush.bf16.msra.mxu2 %v1221_v4  ;;  %1240 = vmatpush.bf16.msra.mxu3 %v1221_v4 }
  0x3b   : > { %524 = vmatpush.bf16.msra.mxu0 %v1220_v5  ;;  %1241 = vmatpush.bf16.msra.mxu1 %v1220_v5 }
  0x3c   : > { %1242 = vmatpush.bf16.msra.mxu2 %v1220_v5  ;;  %1243 = vmatpush.bf16.msra.mxu3 %v1220_v5 }
  0x3f   : > { %525 = vmatpush.bf16.msra.mxu0 %v1219_v6  ;;  %1244 = vmatpush.bf16.msra.mxu1 %v1219_v6 }
  0x40   : > { %1245 = vmatpush.bf16.msra.mxu2 %v1219_v6  ;;  %1246 = vmatpush.bf16.msra.mxu3 %v1219_v6 }
  0x43   : > { %526 = vmatpush.bf16.msra.mxu0 %v1218_v7  ;;  %1247 = vmatpush.bf16.msra.mxu1 %v1218_v7 }
  0x44   : > { %1248 = vmatpush.bf16.msra.mxu2 %v1218_v7  ;;  %1249 = vmatpush.bf16.msra.mxu3 %v1218_v7 }
  0x46   : > { %527 = vmatmul.bf16.vlgmr.msra.gmra.mxu0 %v1186_v8  ;;  %567 = vmatmul.bf16.vlgmr.msra.gmra.mxu1 %v1194_v9 }
  0x47   : > { %607 = vmatmul.bf16.vlgmr.msra.gmra.mxu2 %v1202_v10  ;;  %647 = vmatmul.bf16.vlgmr.msra.gmra.mxu3 %v1210_v11 }
  0x56   : > { %532 = vmatmul.bf16.gmra.mxu0 %v1187_v12  ;;  %572 = vmatmul.bf16.gmra.mxu1 %v1195_v13 }
  0x57   : > { %612 = vmatmul.bf16.gmra.mxu2 %v1203_v14  ;;  %652 = vmatmul.bf16.gmra.mxu3 %v1211_v15 }
  0x66   : > { %537 = vmatmul.bf16.gmra.mxu0 %v1188_v16  ;;  %577 = vmatmul.bf16.gmra.mxu1 %v1196_v17 }
  0x67   : > { %617 = vmatmul.bf16.gmra.mxu2 %v1204_v18  ;;  %657 = vmatmul.bf16.gmra.mxu3 %v1212_v19 }
  0x76   : > { %542 = vmatmul.bf16.gmra.mxu0 %v1189_v20  ;;  %582 = vmatmul.bf16.gmra.mxu1 %v1197_v21 }
  0x77   : > { %622 = vmatmul.bf16.gmra.mxu2 %v1205_v22  ;;  %662 = vmatmul.bf16.gmra.mxu3 %v1213_v23 }
  0x86   : > { %547 = vmatmul.bf16.gmra.mxu0 %v1190_v24  ;;  %587 = vmatmul.bf16.gmra.mxu1 %v1198_v25 }
  0x87   : > { %627 = vmatmul.bf16.gmra.mxu2 %v1206_v26  ;;  %667 = vmatmul.bf16.gmra.mxu3 %v1214_v27 }
  0x96   : > { %552 = vmatmul.bf16.gmra.mxu0 %v1191_v28  ;;  %592 = vmatmul.bf16.gmra.mxu1 %v1199_v29 }
  0x97   : > { %632 = vmatmul.bf16.gmra.mxu2 %v1207_v30  ;;  %672 = vmatmul.bf16.gmra.mxu3 %v1215_v31 }
  0xa6   : > { %557 = vmatmul.bf16.gmra.mxu0 %v1192_v32  ;;  %597 = vmatmul.bf16.gmra.mxu1 %v1200_v33 }
  0xa7   : > { %637 = vmatmul.bf16.gmra.mxu2 %v1208_v34  ;;  %677 = vmatmul.bf16.gmra.mxu3 %v1216_v35 }
  0xb6   : > { %562 = vmatmul.bf16.gmra.mxu0 %v1193_v36  ;;  %602 = vmatmul.bf16.gmra.mxu1 %v1201_v37 }
  0xb7   : > { %642 = vmatmul.bf16.gmra.mxu2 %v1209_v38  ;;  %682 = vmatmul.bf16.gmra.mxu3 %v1217_v39 }
  0xc3   : > { %v528_v41 = vpop.f32.mrf.mxu0  ;;  %v568_v42 = vpop.f32.mrf.mxu1 }
  0xc4   : > { %v529_v43 = vadd.f32 %v1516_v40, %v528_v41  ;;  %v569_v44 = vadd.f32 %v1516_v40, %v568_v42 }
  0xc6   : > { %v688_v45 = vmul.f32 0.1, %v529_v43  ;;  %v704_v46 = vmul.f32 0.1, %v569_v44 }
  0xc8   : > { %v752_v47 = vmax.f32 %v529_v43, %v688_v45  ;;  %v768_v48 = vmax.f32 %v569_v44, %v704_v46 }
  0xca   : > { %v816_v49 = vpack.c.bf16 %v752_v47, %v752_v47  ;;  %v832_v50 = vpack.c.bf16 %v768_v48, %v768_v48  ;;  %v608_v51 = vpop.f32.mrf.mxu2  ;;  %v648_v52 = vpop.f32.mrf.mxu3 }
  0xcb   : > { %v609_v53 = vadd.f32 %v1516_v40, %v608_v51  ;;  %v649_v54 = vadd.f32 %v1516_v40, %v648_v52  ;;  %v530_v55 = vpop.f32.mrf.mxu0  ;;  %v570_v56 = vpop.f32.mrf.mxu1 }
  0xcc   : > { %881 = vst.msk [vmem:[%s1523_s26] sm:$0xf] %vm880_vm0, %v816_v49  ;;  %v531_v57 = vadd.f32 %v1516_v40, %v530_v55  ;;  %v571_v58 = vadd.f32 %v1516_v40, %v570_v56 }
  0xcd   : > { %897 = vst.msk [vmem:[%s1523_s26 + $0x40] sm:$0xf] %vm880_vm0, %v832_v50  ;;  %v720_v59 = vmul.f32 0.1, %v609_v53  ;;  %v736_v60 = vmul.f32 0.1, %v649_v54 }
  0xce   : > { %v689_v61 = vmul.f32 0.1, %v531_v57  ;;  %v705_v62 = vmul.f32 0.1, %v571_v58 }
  0xcf   : > { %v784_v63 = vmax.f32 %v609_v53, %v720_v59  ;;  %v800_v0 = vmax.f32 %v649_v54, %v736_v60 }
  0xd0   : > { %v753_v1 = vmax.f32 %v531_v57, %v689_v61  ;;  %v769_v2 = vmax.f32 %v571_v58, %v705_v62 }
  0xd1   : > { %v848_v3 = vpack.c.bf16 %v784_v63, %v784_v63  ;;  %v864_v4 = vpack.c.bf16 %v800_v0, %v800_v0 }
  0xd2   : > { %v817_v5 = vpack.c.bf16 %v753_v1, %v753_v1  ;;  %v833_v6 = vpack.c.bf16 %v769_v2, %v769_v2  ;;  %v610_v7 = vpop.f32.mrf.mxu2  ;;  %v650_v8 = vpop.f32.mrf.mxu3 }
  0xd3   : > { %913 = vst.msk [vmem:[%s1523_s26 + $0x80] sm:$0xf] %vm880_vm0, %v848_v3  ;;  %v611_v9 = vadd.f32 %v1516_v40, %v610_v7  ;;  %v651_v10 = vadd.f32 %v1516_v40, %v650_v8  ;;  %v533_v11 = vpop.f32.mrf.mxu0  ;;  %v573_v12 = vpop.f32.mrf.mxu1 }
  0xd4   : > { %929 = vst.msk [vmem:[%s1523_s26 + $0xc0] sm:$0xf] %vm880_vm0, %v864_v4  ;;  %v534_v13 = vadd.f32 %v1516_v40, %v533_v11  ;;  %v574_v14 = vadd.f32 %v1516_v40, %v573_v12 }
  0xd5   : > { %882 = vst.msk [vmem:[%s1523_s26 + $0x4] sm:$0xf] %vm880_vm0, %v817_v5  ;;  %v721_v15 = vmul.f32 0.1, %v611_v9  ;;  %v737_v16 = vmul.f32 0.1, %v651_v10 }
  0xd6   : > { %898 = vst.msk [vmem:[%s1523_s26 + $0x44] sm:$0xf] %vm880_vm0, %v833_v6  ;;  %v690_v17 = vmul.f32 0.1, %v534_v13  ;;  %v706_v18 = vmul.f32 0.1, %v574_v14 }
  0xd7   : > { %v785_v19 = vmax.f32 %v611_v9, %v721_v15  ;;  %v801_v20 = vmax.f32 %v651_v10, %v737_v16 }
  0xd8   : > { %v754_v21 = vmax.f32 %v534_v13, %v690_v17  ;;  %v770_v22 = vmax.f32 %v574_v14, %v706_v18 }
  0xd9   : > { %v849_v23 = vpack.c.bf16 %v785_v19, %v785_v19  ;;  %v865_v24 = vpack.c.bf16 %v801_v20, %v801_v20 }
  0xda   : > { %v818_v25 = vpack.c.bf16 %v754_v21, %v754_v21  ;;  %v834_v26 = vpack.c.bf16 %v770_v22, %v770_v22  ;;  %v613_v27 = vpop.f32.mrf.mxu2  ;;  %v653_v28 = vpop.f32.mrf.mxu3 }
  0xdb   : > { %914 = vst.msk [vmem:[%s1523_s26 + $0x84] sm:$0xf] %vm880_vm0, %v849_v23  ;;  %v614_v29 = vadd.f32 %v1516_v40, %v613_v27  ;;  %v654_v30 = vadd.f32 %v1516_v40, %v653_v28  ;;  %v535_v31 = vpop.f32.mrf.mxu0  ;;  %v575_v32 = vpop.f32.mrf.mxu1 }
  0xdc   : > { %930 = vst.msk [vmem:[%s1523_s26 + $0xc4] sm:$0xf] %vm880_vm0, %v865_v24  ;;  %v536_v33 = vadd.f32 %v1516_v40, %v535_v31  ;;  %v576_v34 = vadd.f32 %v1516_v40, %v575_v32 }
  0xdd   : > { %883 = vst.msk [vmem:[%s1523_s26 + $0x8] sm:$0xf] %vm880_vm0, %v818_v25  ;;  %v722_v35 = vmul.f32 0.1, %v614_v29  ;;  %v738_v36 = vmul.f32 0.1, %v654_v30 }
  0xde   : > { %899 = vst.msk [vmem:[%s1523_s26 + $0x48] sm:$0xf] %vm880_vm0, %v834_v26  ;;  %v691_v37 = vmul.f32 0.1, %v536_v33  ;;  %v707_v38 = vmul.f32 0.1, %v576_v34 }
  0xdf   : > { %v786_v39 = vmax.f32 %v614_v29, %v722_v35  ;;  %v802_v41 = vmax.f32 %v654_v30, %v738_v36 }
  0xe0   : > { %v755_v42 = vmax.f32 %v536_v33, %v691_v37  ;;  %v771_v43 = vmax.f32 %v576_v34, %v707_v38 }
  0xe1   : > { %v850_v44 = vpack.c.bf16 %v786_v39, %v786_v39  ;;  %v866_v45 = vpack.c.bf16 %v802_v41, %v802_v41 }
  0xe2   : > { %v819_v46 = vpack.c.bf16 %v755_v42, %v755_v42  ;;  %v835_v47 = vpack.c.bf16 %v771_v43, %v771_v43  ;;  %v615_v48 = vpop.f32.mrf.mxu2  ;;  %v655_v49 = vpop.f32.mrf.mxu3 }
  0xe3   : > { %915 = vst.msk [vmem:[%s1523_s26 + $0x88] sm:$0xf] %vm880_vm0, %v850_v44  ;;  %v616_v50 = vadd.f32 %v1516_v40, %v615_v48  ;;  %v656_v51 = vadd.f32 %v1516_v40, %v655_v49  ;;  %v538_v52 = vpop.f32.mrf.mxu0  ;;  %v578_v53 = vpop.f32.mrf.mxu1 }
  0xe4   : > { %931 = vst.msk [vmem:[%s1523_s26 + $0xc8] sm:$0xf] %vm880_vm0, %v866_v45  ;;  %v539_v54 = vadd.f32 %v1516_v40, %v538_v52  ;;  %v579_v55 = vadd.f32 %v1516_v40, %v578_v53 }
  0xe5   : > { %884 = vst.msk [vmem:[%s1523_s26 + $0xc] sm:$0xf] %vm880_vm0, %v819_v46  ;;  %v723_v56 = vmul.f32 0.1, %v616_v50  ;;  %v739_v57 = vmul.f32 0.1, %v656_v51 }
  0xe6   : > { %900 = vst.msk [vmem:[%s1523_s26 + $0x4c] sm:$0xf] %vm880_vm0, %v835_v47  ;;  %v692_v58 = vmul.f32 0.1, %v539_v54  ;;  %v708_v59 = vmul.f32 0.1, %v579_v55 }
  0xe7   : > { %v787_v60 = vmax.f32 %v616_v50, %v723_v56  ;;  %v803_v61 = vmax.f32 %v656_v51, %v739_v57 }
  0xe8   : > { %v756_v62 = vmax.f32 %v539_v54, %v692_v58  ;;  %v772_v63 = vmax.f32 %v579_v55, %v708_v59 }
  0xe9   : > { %v851_v0 = vpack.c.bf16 %v787_v60, %v787_v60  ;;  %v867_v1 = vpack.c.bf16 %v803_v61, %v803_v61 }
  0xea   : > { %v820_v2 = vpack.c.bf16 %v756_v62, %v756_v62  ;;  %v836_v3 = vpack.c.bf16 %v772_v63, %v772_v63  ;;  %v618_v4 = vpop.f32.mrf.mxu2  ;;  %v658_v5 = vpop.f32.mrf.mxu3 }
  0xeb   : > { %916 = vst.msk [vmem:[%s1523_s26 + $0x8c] sm:$0xf] %vm880_vm0, %v851_v0  ;;  %v619_v6 = vadd.f32 %v1516_v40, %v618_v4  ;;  %v659_v7 = vadd.f32 %v1516_v40, %v658_v5  ;;  %v540_v8 = vpop.f32.mrf.mxu0  ;;  %v580_v9 = vpop.f32.mrf.mxu1 }
  0xec   : > { %932 = vst.msk [vmem:[%s1523_s26 + $0xcc] sm:$0xf] %vm880_vm0, %v867_v1  ;;  %v541_v10 = vadd.f32 %v1516_v40, %v540_v8  ;;  %v581_v11 = vadd.f32 %v1516_v40, %v580_v9 }
  0xed   : > { %885 = vst.msk [vmem:[%s1523_s26 + $0x10] sm:$0xf] %vm880_vm0, %v820_v2  ;;  %v724_v12 = vmul.f32 0.1, %v619_v6  ;;  %v740_v13 = vmul.f32 0.1, %v659_v7 }
  0xee   : > { %901 = vst.msk [vmem:[%s1523_s26 + $0x50] sm:$0xf] %vm880_vm0, %v836_v3  ;;  %v693_v14 = vmul.f32 0.1, %v541_v10  ;;  %v709_v15 = vmul.f32 0.1, %v581_v11 }
  0xef   : > { %v788_v16 = vmax.f32 %v619_v6, %v724_v12  ;;  %v804_v17 = vmax.f32 %v659_v7, %v740_v13 }
  0xf0   : > { %v757_v18 = vmax.f32 %v541_v10, %v693_v14  ;;  %v773_v19 = vmax.f32 %v581_v11, %v709_v15 }
  0xf1   : > { %v852_v20 = vpack.c.bf16 %v788_v16, %v788_v16  ;;  %v868_v21 = vpack.c.bf16 %v804_v17, %v804_v17 }
  0xf2   : > { %v821_v22 = vpack.c.bf16 %v757_v18, %v757_v18  ;;  %v837_v23 = vpack.c.bf16 %v773_v19, %v773_v19  ;;  %v620_v24 = vpop.f32.mrf.mxu2  ;;  %v660_v25 = vpop.f32.mrf.mxu3 }
  0xf3   : > { %917 = vst.msk [vmem:[%s1523_s26 + $0x90] sm:$0xf] %vm880_vm0, %v852_v20  ;;  %v621_v26 = vadd.f32 %v1516_v40, %v620_v24  ;;  %v661_v27 = vadd.f32 %v1516_v40, %v660_v25  ;;  %v543_v28 = vpop.f32.mrf.mxu0  ;;  %v583_v29 = vpop.f32.mrf.mxu1 }
  0xf4   : > { %933 = vst.msk [vmem:[%s1523_s26 + $0xd0] sm:$0xf] %vm880_vm0, %v868_v21  ;;  %v544_v30 = vadd.f32 %v1516_v40, %v543_v28  ;;  %v584_v31 = vadd.f32 %v1516_v40, %v583_v29 }
  0xf5   : > { %886 = vst.msk [vmem:[%s1523_s26 + $0x14] sm:$0xf] %vm880_vm0, %v821_v22  ;;  %v725_v32 = vmul.f32 0.1, %v621_v26  ;;  %v741_v33 = vmul.f32 0.1, %v661_v27 }
  0xf6   : > { %902 = vst.msk [vmem:[%s1523_s26 + $0x54] sm:$0xf] %vm880_vm0, %v837_v23  ;;  %v694_v34 = vmul.f32 0.1, %v544_v30  ;;  %v710_v35 = vmul.f32 0.1, %v584_v31 }
  0xf7   : > { %v789_v36 = vmax.f32 %v621_v26, %v725_v32  ;;  %v805_v37 = vmax.f32 %v661_v27, %v741_v33 }
  0xf8   : > { %v758_v38 = vmax.f32 %v544_v30, %v694_v34  ;;  %v774_v39 = vmax.f32 %v584_v31, %v710_v35 }
  0xf9   : > { %v853_v41 = vpack.c.bf16 %v789_v36, %v789_v36  ;;  %v869_v42 = vpack.c.bf16 %v805_v37, %v805_v37 }
  0xfa   : > { %v822_v43 = vpack.c.bf16 %v758_v38, %v758_v38  ;;  %v838_v44 = vpack.c.bf16 %v774_v39, %v774_v39  ;;  %v623_v45 = vpop.f32.mrf.mxu2  ;;  %v663_v46 = vpop.f32.mrf.mxu3 }
  0xfb   : > { %918 = vst.msk [vmem:[%s1523_s26 + $0x94] sm:$0xf] %vm880_vm0, %v853_v41  ;;  %v624_v47 = vadd.f32 %v1516_v40, %v623_v45  ;;  %v664_v48 = vadd.f32 %v1516_v40, %v663_v46  ;;  %v545_v49 = vpop.f32.mrf.mxu0  ;;  %v585_v50 = vpop.f32.mrf.mxu1 }
  0xfc   : > { %934 = vst.msk [vmem:[%s1523_s26 + $0xd4] sm:$0xf] %vm880_vm0, %v869_v42  ;;  %v546_v51 = vadd.f32 %v1516_v40, %v545_v49  ;;  %v586_v52 = vadd.f32 %v1516_v40, %v585_v50 }
  0xfd   : > { %887 = vst.msk [vmem:[%s1523_s26 + $0x18] sm:$0xf] %vm880_vm0, %v822_v43  ;;  %v726_v53 = vmul.f32 0.1, %v624_v47  ;;  %v742_v54 = vmul.f32 0.1, %v664_v48 }
  0xfe   : > { %903 = vst.msk [vmem:[%s1523_s26 + $0x58] sm:$0xf] %vm880_vm0, %v838_v44  ;;  %v695_v55 = vmul.f32 0.1, %v546_v51  ;;  %v711_v56 = vmul.f32 0.1, %v586_v52 }
  0xff   : > { %v790_v57 = vmax.f32 %v624_v47, %v726_v53  ;;  %v806_v58 = vmax.f32 %v664_v48, %v742_v54 }
 0x100   : > { %v759_v59 = vmax.f32 %v546_v51, %v695_v55  ;;  %v775_v60 = vmax.f32 %v586_v52, %v711_v56 }
 0x101   : > { %v854_v61 = vpack.c.bf16 %v790_v57, %v790_v57  ;;  %v870_v62 = vpack.c.bf16 %v806_v58, %v806_v58 }
 0x102   : > { %v823_v63 = vpack.c.bf16 %v759_v59, %v759_v59  ;;  %v839_v0 = vpack.c.bf16 %v775_v60, %v775_v60  ;;  %v625_v1 = vpop.f32.mrf.mxu2  ;;  %v665_v2 = vpop.f32.mrf.mxu3 }
 0x103   : > { %919 = vst.msk [vmem:[%s1523_s26 + $0x98] sm:$0xf] %vm880_vm0, %v854_v61  ;;  %v626_v3 = vadd.f32 %v1516_v40, %v625_v1  ;;  %v666_v4 = vadd.f32 %v1516_v40, %v665_v2  ;;  %v548_v5 = vpop.f32.mrf.mxu0  ;;  %v588_v6 = vpop.f32.mrf.mxu1 }
 0x104   : > { %935 = vst.msk [vmem:[%s1523_s26 + $0xd8] sm:$0xf] %vm880_vm0, %v870_v62  ;;  %v549_v7 = vadd.f32 %v1516_v40, %v548_v5  ;;  %v589_v8 = vadd.f32 %v1516_v40, %v588_v6 }
 0x105   : > { %888 = vst.msk [vmem:[%s1523_s26 + $0x1c] sm:$0xf] %vm880_vm0, %v823_v63  ;;  %v727_v9 = vmul.f32 0.1, %v626_v3  ;;  %v743_v10 = vmul.f32 0.1, %v666_v4 }
 0x106   : > { %904 = vst.msk [vmem:[%s1523_s26 + $0x5c] sm:$0xf] %vm880_vm0, %v839_v0  ;;  %v696_v11 = vmul.f32 0.1, %v549_v7  ;;  %v712_v12 = vmul.f32 0.1, %v589_v8 }
 0x107   : > { %v791_v13 = vmax.f32 %v626_v3, %v727_v9  ;;  %v807_v14 = vmax.f32 %v666_v4, %v743_v10 }
 0x108   : > { %v760_v15 = vmax.f32 %v549_v7, %v696_v11  ;;  %v776_v16 = vmax.f32 %v589_v8, %v712_v12 }
 0x109   : > { %v855_v17 = vpack.c.bf16 %v791_v13, %v791_v13  ;;  %v871_v18 = vpack.c.bf16 %v807_v14, %v807_v14 }
 0x10a   : > { %v824_v19 = vpack.c.bf16 %v760_v15, %v760_v15  ;;  %v840_v20 = vpack.c.bf16 %v776_v16, %v776_v16  ;;  %v628_v21 = vpop.f32.mrf.mxu2  ;;  %v668_v22 = vpop.f32.mrf.mxu3 }
 0x10b   : > { %920 = vst.msk [vmem:[%s1523_s26 + $0x9c] sm:$0xf] %vm880_vm0, %v855_v17  ;;  %v629_v23 = vadd.f32 %v1516_v40, %v628_v21  ;;  %v669_v24 = vadd.f32 %v1516_v40, %v668_v22  ;;  %v550_v25 = vpop.f32.mrf.mxu0  ;;  %v590_v26 = vpop.f32.mrf.mxu1 }
 0x10c   : > { %936 = vst.msk [vmem:[%s1523_s26 + $0xdc] sm:$0xf] %vm880_vm0, %v871_v18  ;;  %v551_v27 = vadd.f32 %v1516_v40, %v550_v25  ;;  %v591_v28 = vadd.f32 %v1516_v40, %v590_v26 }
 0x10d   : > { %889 = vst.msk [vmem:[%s1523_s26 + $0x20] sm:$0xf] %vm880_vm0, %v824_v19  ;;  %v728_v29 = vmul.f32 0.1, %v629_v23  ;;  %v744_v30 = vmul.f32 0.1, %v669_v24 }
 0x10e   : > { %905 = vst.msk [vmem:[%s1523_s26 + $0x60] sm:$0xf] %vm880_vm0, %v840_v20  ;;  %v697_v31 = vmul.f32 0.1, %v551_v27  ;;  %v713_v32 = vmul.f32 0.1, %v591_v28 }
 0x10f   : > { %v792_v33 = vmax.f32 %v629_v23, %v728_v29  ;;  %v808_v34 = vmax.f32 %v669_v24, %v744_v30 }
 0x110   : > { %v761_v35 = vmax.f32 %v551_v27, %v697_v31  ;;  %v777_v36 = vmax.f32 %v591_v28, %v713_v32 }
 0x111   : > { %v856_v37 = vpack.c.bf16 %v792_v33, %v792_v33  ;;  %v872_v38 = vpack.c.bf16 %v808_v34, %v808_v34 }
 0x112   : > { %v825_v39 = vpack.c.bf16 %v761_v35, %v761_v35  ;;  %v841_v41 = vpack.c.bf16 %v777_v36, %v777_v36  ;;  %v630_v42 = vpop.f32.mrf.mxu2  ;;  %v670_v43 = vpop.f32.mrf.mxu3 }
 0x113   : > { %921 = vst.msk [vmem:[%s1523_s26 + $0xa0] sm:$0xf] %vm880_vm0, %v856_v37  ;;  %v631_v44 = vadd.f32 %v1516_v40, %v630_v42  ;;  %v671_v45 = vadd.f32 %v1516_v40, %v670_v43  ;;  %v553_v46 = vpop.f32.mrf.mxu0  ;;  %v593_v47 = vpop.f32.mrf.mxu1 }
 0x114   : > { %937 = vst.msk [vmem:[%s1523_s26 + $0xe0] sm:$0xf] %vm880_vm0, %v872_v38  ;;  %v554_v48 = vadd.f32 %v1516_v40, %v553_v46  ;;  %v594_v49 = vadd.f32 %v1516_v40, %v593_v47 }
 0x115   : > { %890 = vst.msk [vmem:[%s1523_s26 + $0x24] sm:$0xf] %vm880_vm0, %v825_v39  ;;  %v729_v50 = vmul.f32 0.1, %v631_v44  ;;  %v745_v51 = vmul.f32 0.1, %v671_v45 }
 0x116   : > { %906 = vst.msk [vmem:[%s1523_s26 + $0x64] sm:$0xf] %vm880_vm0, %v841_v41  ;;  %v698_v52 = vmul.f32 0.1, %v554_v48  ;;  %v714_v53 = vmul.f32 0.1, %v594_v49 }
 0x117   : > { %v793_v54 = vmax.f32 %v631_v44, %v729_v50  ;;  %v809_v55 = vmax.f32 %v671_v45, %v745_v51 }
 0x118   : > { %v762_v56 = vmax.f32 %v554_v48, %v698_v52  ;;  %v778_v57 = vmax.f32 %v594_v49, %v714_v53 }
 0x119   : > { %v857_v58 = vpack.c.bf16 %v793_v54, %v793_v54  ;;  %v873_v59 = vpack.c.bf16 %v809_v55, %v809_v55 }
 0x11a   : > { %v826_v60 = vpack.c.bf16 %v762_v56, %v762_v56  ;;  %v842_v61 = vpack.c.bf16 %v778_v57, %v778_v57  ;;  %v633_v62 = vpop.f32.mrf.mxu2  ;;  %v673_v63 = vpop.f32.mrf.mxu3 }
 0x11b   : > { %922 = vst.msk [vmem:[%s1523_s26 + $0xa4] sm:$0xf] %vm880_vm0, %v857_v58  ;;  %v634_v0 = vadd.f32 %v1516_v40, %v633_v62  ;;  %v674_v1 = vadd.f32 %v1516_v40, %v673_v63  ;;  %v555_v2 = vpop.f32.mrf.mxu0  ;;  %v595_v3 = vpop.f32.mrf.mxu1 }
 0x11c   : > { %938 = vst.msk [vmem:[%s1523_s26 + $0xe4] sm:$0xf] %vm880_vm0, %v873_v59  ;;  %v556_v4 = vadd.f32 %v1516_v40, %v555_v2  ;;  %v596_v5 = vadd.f32 %v1516_v40, %v595_v3 }
 0x11d   : > { %891 = vst.msk [vmem:[%s1523_s26 + $0x28] sm:$0xf] %vm880_vm0, %v826_v60  ;;  %v730_v6 = vmul.f32 0.1, %v634_v0  ;;  %v746_v7 = vmul.f32 0.1, %v674_v1 }
 0x11e   : > { %907 = vst.msk [vmem:[%s1523_s26 + $0x68] sm:$0xf] %vm880_vm0, %v842_v61  ;;  %v699_v8 = vmul.f32 0.1, %v556_v4  ;;  %v715_v9 = vmul.f32 0.1, %v596_v5 }
 0x11f   : > { %v794_v10 = vmax.f32 %v634_v0, %v730_v6  ;;  %v810_v11 = vmax.f32 %v674_v1, %v746_v7 }
 0x120   : > { %v763_v12 = vmax.f32 %v556_v4, %v699_v8  ;;  %v779_v13 = vmax.f32 %v596_v5, %v715_v9 }
 0x121   : > { %v858_v14 = vpack.c.bf16 %v794_v10, %v794_v10  ;;  %v874_v15 = vpack.c.bf16 %v810_v11, %v810_v11 }
 0x122   : > { %v827_v16 = vpack.c.bf16 %v763_v12, %v763_v12  ;;  %v843_v17 = vpack.c.bf16 %v779_v13, %v779_v13  ;;  %v635_v18 = vpop.f32.mrf.mxu2  ;;  %v675_v19 = vpop.f32.mrf.mxu3 }
 0x123   : > { %923 = vst.msk [vmem:[%s1523_s26 + $0xa8] sm:$0xf] %vm880_vm0, %v858_v14  ;;  %v636_v20 = vadd.f32 %v1516_v40, %v635_v18  ;;  %v676_v21 = vadd.f32 %v1516_v40, %v675_v19  ;;  %v558_v22 = vpop.f32.mrf.mxu0  ;;  %v598_v23 = vpop.f32.mrf.mxu1 }
 0x124   : > { %939 = vst.msk [vmem:[%s1523_s26 + $0xe8] sm:$0xf] %vm880_vm0, %v874_v15  ;;  %v559_v24 = vadd.f32 %v1516_v40, %v558_v22  ;;  %v599_v25 = vadd.f32 %v1516_v40, %v598_v23 }
 0x125   : > { %892 = vst.msk [vmem:[%s1523_s26 + $0x2c] sm:$0xf] %vm880_vm0, %v827_v16  ;;  %v731_v26 = vmul.f32 0.1, %v636_v20  ;;  %v747_v27 = vmul.f32 0.1, %v676_v21 }
 0x126   : > { %908 = vst.msk [vmem:[%s1523_s26 + $0x6c] sm:$0xf] %vm880_vm0, %v843_v17  ;;  %v700_v28 = vmul.f32 0.1, %v559_v24  ;;  %v716_v29 = vmul.f32 0.1, %v599_v25 }
 0x127   : > { %v795_v30 = vmax.f32 %v636_v20, %v731_v26  ;;  %v811_v31 = vmax.f32 %v676_v21, %v747_v27 }
 0x128   : > { %v764_v32 = vmax.f32 %v559_v24, %v700_v28  ;;  %v780_v33 = vmax.f32 %v599_v25, %v716_v29 }
 0x129   : > { %v859_v34 = vpack.c.bf16 %v795_v30, %v795_v30  ;;  %v875_v35 = vpack.c.bf16 %v811_v31, %v811_v31 }
 0x12a   : > { %v828_v36 = vpack.c.bf16 %v764_v32, %v764_v32  ;;  %v844_v37 = vpack.c.bf16 %v780_v33, %v780_v33  ;;  %v638_v38 = vpop.f32.mrf.mxu2  ;;  %v678_v39 = vpop.f32.mrf.mxu3 }
 0x12b   : > { %924 = vst.msk [vmem:[%s1523_s26 + $0xac] sm:$0xf] %vm880_vm0, %v859_v34  ;;  %v639_v41 = vadd.f32 %v1516_v40, %v638_v38  ;;  %v679_v42 = vadd.f32 %v1516_v40, %v678_v39  ;;  %v560_v43 = vpop.f32.mrf.mxu0  ;;  %v600_v44 = vpop.f32.mrf.mxu1 }
 0x12c   : > { %940 = vst.msk [vmem:[%s1523_s26 + $0xec] sm:$0xf] %vm880_vm0, %v875_v35  ;;  %v561_v45 = vadd.f32 %v1516_v40, %v560_v43  ;;  %v601_v46 = vadd.f32 %v1516_v40, %v600_v44 }
 0x12d   : > { %893 = vst.msk [vmem:[%s1523_s26 + $0x30] sm:$0xf] %vm880_vm0, %v828_v36  ;;  %v732_v47 = vmul.f32 0.1, %v639_v41  ;;  %v748_v48 = vmul.f32 0.1, %v679_v42 }
 0x12e   : > { %909 = vst.msk [vmem:[%s1523_s26 + $0x70] sm:$0xf] %vm880_vm0, %v844_v37  ;;  %v701_v49 = vmul.f32 0.1, %v561_v45  ;;  %v717_v50 = vmul.f32 0.1, %v601_v46 }
 0x12f   : > { %v796_v51 = vmax.f32 %v639_v41, %v732_v47  ;;  %v812_v52 = vmax.f32 %v679_v42, %v748_v48 }
 0x130   : > { %v765_v53 = vmax.f32 %v561_v45, %v701_v49  ;;  %v781_v54 = vmax.f32 %v601_v46, %v717_v50 }
 0x131   : > { %v860_v55 = vpack.c.bf16 %v796_v51, %v796_v51  ;;  %v876_v56 = vpack.c.bf16 %v812_v52, %v812_v52 }
 0x132   : > { %v829_v57 = vpack.c.bf16 %v765_v53, %v765_v53  ;;  %v845_v58 = vpack.c.bf16 %v781_v54, %v781_v54  ;;  %v640_v59 = vpop.f32.mrf.mxu2  ;;  %v680_v60 = vpop.f32.mrf.mxu3 }
 0x133   : > { %925 = vst.msk [vmem:[%s1523_s26 + $0xb0] sm:$0xf] %vm880_vm0, %v860_v55  ;;  %v641_v61 = vadd.f32 %v1516_v40, %v640_v59  ;;  %v681_v62 = vadd.f32 %v1516_v40, %v680_v60  ;;  %v563_v63 = vpop.f32.mrf.mxu0  ;;  %v603_v0 = vpop.f32.mrf.mxu1 }
 0x134   : > { %941 = vst.msk [vmem:[%s1523_s26 + $0xf0] sm:$0xf] %vm880_vm0, %v876_v56  ;;  %v564_v1 = vadd.f32 %v1516_v40, %v563_v63  ;;  %v604_v2 = vadd.f32 %v1516_v40, %v603_v0 }
 0x135   : > { %894 = vst.msk [vmem:[%s1523_s26 + $0x34] sm:$0xf] %vm880_vm0, %v829_v57  ;;  %v733_v3 = vmul.f32 0.1, %v641_v61  ;;  %v749_v4 = vmul.f32 0.1, %v681_v62 }
 0x136   : > { %910 = vst.msk [vmem:[%s1523_s26 + $0x74] sm:$0xf] %vm880_vm0, %v845_v58  ;;  %v702_v5 = vmul.f32 0.1, %v564_v1  ;;  %v718_v6 = vmul.f32 0.1, %v604_v2 }
 0x137   : > { %v797_v7 = vmax.f32 %v641_v61, %v733_v3  ;;  %v813_v8 = vmax.f32 %v681_v62, %v749_v4 }
 0x138   : > { %v766_v9 = vmax.f32 %v564_v1, %v702_v5  ;;  %v782_v10 = vmax.f32 %v604_v2, %v718_v6 }
 0x139   : > { %v861_v11 = vpack.c.bf16 %v797_v7, %v797_v7  ;;  %v877_v12 = vpack.c.bf16 %v813_v8, %v813_v8 }
 0x13a   : > { %v830_v13 = vpack.c.bf16 %v766_v9, %v766_v9  ;;  %v846_v14 = vpack.c.bf16 %v782_v10, %v782_v10  ;;  %v643_v15 = vpop.f32.mrf.mxu2  ;;  %v683_v16 = vpop.f32.mrf.mxu3 }
 0x13b   : > { %926 = vst.msk [vmem:[%s1523_s26 + $0xb4] sm:$0xf] %vm880_vm0, %v861_v11  ;;  %v644_v17 = vadd.f32 %v1516_v40, %v643_v15  ;;  %v684_v18 = vadd.f32 %v1516_v40, %v683_v16  ;;  %v565_v19 = vpop.f32.mrf.mxu0  ;;  %v605_v20 = vpop.f32.mrf.mxu1 }
 0x13c   : > { %942 = vst.msk [vmem:[%s1523_s26 + $0xf4] sm:$0xf] %vm880_vm0, %v877_v12  ;;  %v566_v21 = vadd.f32 %v1516_v40, %v565_v19  ;;  %v606_v22 = vadd.f32 %v1516_v40, %v605_v20 }
 0x13d   : > { %895 = vst.msk [vmem:[%s1523_s26 + $0x38] sm:$0xf] %vm880_vm0, %v830_v13  ;;  %v734_v23 = vmul.f32 0.1, %v644_v17  ;;  %v750_v24 = vmul.f32 0.1, %v684_v18 }
 0x13e   : > { %911 = vst.msk [vmem:[%s1523_s26 + $0x78] sm:$0xf] %vm880_vm0, %v846_v14  ;;  %v703_v25 = vmul.f32 0.1, %v566_v21  ;;  %v719_v26 = vmul.f32 0.1, %v606_v22 }
 0x13f   : > { %v798_v27 = vmax.f32 %v644_v17, %v734_v23  ;;  %v814_v28 = vmax.f32 %v684_v18, %v750_v24 }
 0x140   : > { %v767_v29 = vmax.f32 %v566_v21, %v703_v25  ;;  %v783_v30 = vmax.f32 %v606_v22, %v719_v26 }
 0x141   : > { %v862_v31 = vpack.c.bf16 %v798_v27, %v798_v27  ;;  %v878_v32 = vpack.c.bf16 %v814_v28, %v814_v28 }
 0x142   : > { %v831_v33 = vpack.c.bf16 %v767_v29, %v767_v29  ;;  %v847_v34 = vpack.c.bf16 %v783_v30, %v783_v30  ;;  %v645_v35 = vpop.f32.mrf.mxu2  ;;  %v685_v36 = vpop.f32.mrf.mxu3 }
 0x143   : > { %927 = vst.msk [vmem:[%s1523_s26 + $0xb8] sm:$0xf] %vm880_vm0, %v862_v31  ;;  %v646_v37 = vadd.f32 %v1516_v40, %v645_v35  ;;  %v686_v38 = vadd.f32 %v1516_v40, %v685_v36 }
 0x144   : > { %943 = vst.msk [vmem:[%s1523_s26 + $0xf8] sm:$0xf] %vm880_vm0, %v878_v32 }
 0x145   : > { %896 = vst.msk [vmem:[%s1523_s26 + $0x3c] sm:$0xf] %vm880_vm0, %v831_v33  ;;  %v735_v39 = vmul.f32 0.1, %v646_v37  ;;  %v751_v41 = vmul.f32 0.1, %v686_v38 }
 0x146   : > { %912 = vst.msk [vmem:[%s1523_s26 + $0x7c] sm:$0xf] %vm880_vm0, %v847_v34 }
 0x147   : > { %v799_v42 = vmax.f32 %v646_v37, %v735_v39  ;;  %v815_v43 = vmax.f32 %v686_v38, %v751_v41 }
 0x149   : > { %v863_v44 = vpack.c.bf16 %v799_v42, %v799_v42  ;;  %v879_v45 = vpack.c.bf16 %v815_v43, %v815_v43 }
 0x14b   : > { %928 = vst.msk [vmem:[%s1523_s26 + $0xbc] sm:$0xf] %vm880_vm0, %v863_v44 }
 0x14c   : > { %944 = vst.msk [vmem:[%s1523_s26 + $0xfc] sm:$0xf] %vm880_vm0, %v879_v45 }
 0x14d PF: > { %p13_p7 = scmp.ge.s32.totalorder %s1400_s17, 4   ;;  %s1735_s12 = smov %s1348_s13 }
 0x14e   : > { %s1736_s13 = smov %s1352_s14  ;;  %s1737_s14 = smov %s1410_s20 }
 0x14f   : > { %s1738_s15 = smov %s1400_s17  ;;  %15 = sbr.rel (!%p13_p7) target bundleno = 3 (0x3), region = 72 }
 0x154   :  { %967 = vsyncpa [#allocation3], 1 }
 0x155   :  { %969 = vsyncpa [#allocation3 + $0x1], 1 }

</bundles_post_ra>
